<compile_context>
chip_gen: v6e
topology: v6e:2x2x1
jax: 0.10.0
libtpu: 0.0.40
codegen_flags: <defaults>
</compile_context>

<pallas_src>
import math

import jax
import jax.numpy as jnp
from jax.experimental import pallas as pl
from jax.experimental.pallas import tpu as pltpu

EPS = 1e-5
LANE = 128


def _round_up(n: int, m: int) -> int:
    return ((n + m - 1) // m) * m


def _global_embedding_kernel(x_ref, w1_ref, gamma_ref, beta_ref, w2_ref, out_ref):
    x = x_ref[...]                                                  # [N, Dp]

    # ---- Linear(input_dim, hidden_dim), bias cancelled by BN1 ----
    h = jnp.dot(x, w1_ref[...], preferred_element_type=jnp.float32)  # [N, Hp]

    # ---- BatchNorm1d(hidden_dim), affine — fused scale/shift + ReLU ----
    m1 = jnp.mean(h, axis=0, keepdims=True)                         # [1, Hp]
    d1 = h - m1                                                     # reused for var
    v1 = jnp.mean(d1 * d1, axis=0, keepdims=True)
    scale1 = gamma_ref[...] * jax.lax.rsqrt(v1 + EPS)               # EUP rsqrt
    h = jnp.maximum(d1 * scale1 + beta_ref[...], 0.0)               # BN1 + ReLU

    # ---- Linear(hidden_dim, output_dim), bias cancelled by BN2 ----
    y = jnp.dot(h, w2_ref[...], preferred_element_type=jnp.float32)  # [N, Op]

    # ---- BatchNorm1d(output_dim, affine=False) ----
    m2 = jnp.mean(y, axis=0, keepdims=True)
    d2 = y - m2
    v2 = jnp.mean(d2 * d2, axis=0, keepdims=True)
    out_ref[...] = d2 * jax.lax.rsqrt(v2 + EPS)


def global_embedding(x, w1, b1, gamma, beta, w2, b2):
    """Forward pass of GlobalEmbedding.

    b1 / b2 are accepted for parameter parity with the PyTorch module but are
    not used: a Linear bias immediately followed by training-mode BatchNorm is
    exactly cancelled by the batch-mean subtraction.
    """
    del b1, b2  # mathematically a no-op through the BatchNorms

    N, D_in = x.shape
    H = w1.shape[1]
    D_out = w2.shape[1]

    # Lane-dense padding of all feature dims to multiples of 128.
    dp = _round_up(D_in, LANE)
    hp = _round_up(H, LANE)
    op = _round_up(D_out, LANE)

    f32 = jnp.float32
    xp = jnp.pad(x.astype(f32), ((0, 0), (0, dp - D_in)))
    w1p = jnp.pad(w1.astype(f32), ((0, dp - D_in), (0, hp - H)))
    gp = jnp.pad(gamma.reshape(1, H).astype(f32), ((0, 0), (0, hp - H)),
                 constant_values=1.0)
    bp = jnp.pad(beta.reshape(1, H).astype(f32), ((0, 0), (0, hp - H)))
    w2p = jnp.pad(w2.astype(f32), ((0, hp - H), (0, op - D_out)))

    # VMEM limit: actual padded footprint (double-buffered I/O + live
    # intermediates) plus headroom, capped well under v7x's 64 MiB.
    nbytes_io = 4 * (N * dp + dp * hp + hp * op + N * op + 3 * hp)
    nbytes_live = 4 * (N * hp + N * op)
    vmem_bytes = int(min(max(2 * nbytes_io + nbytes_live + (2 << 20), 1 << 20),
                         48 << 20))

    full = lambda shape: pl.BlockSpec(shape, lambda: tuple(0 for _ in shape))

    out_p = pl.pallas_call(
        _global_embedding_kernel,
        out_shape=jax.ShapeDtypeStruct((N, op), jnp.float32),
        in_specs=[
            full((N, dp)),    # x
            full((dp, hp)),   # w1
            full((1, hp)),    # gamma
            full((1, hp)),    # beta
            full((hp, op)),   # w2
        ],
        out_specs=full((N, op)),
        compiler_params=pltpu.CompilerParams(vmem_limit_bytes=vmem_bytes),
    )(xp, w1p, gp, bp, w2p)

    return out_p[:, :D_out]


def global_embedding_ref(x, w1, b1, gamma, beta, w2, b2):
    """Pure-JAX reference with the *original* module semantics (biases kept)."""
    h = x @ w1 + b1
    m1 = h.mean(0, keepdims=True)
    v1 = ((h - m1) ** 2).mean(0, keepdims=True)
    h = (h - m1) / jnp.sqrt(v1 + EPS) * gamma + beta
    h = jnp.maximum(h, 0.0)
    y = h @ w2 + b2
    m2 = y.mean(0, keepdims=True)
    v2 = ((y - m2) ** 2).mean(0, keepdims=True)
    return (y - m2) / jnp.sqrt(v2 + EPS)


if __name__ == "__main__":
    # Small shapes consistent with the module: x: [batch, input_dim].
    N, D_IN, H, D_OUT = 8, 32, 64, 32

    key = jax.random.PRNGKey(0)
    kx, kw1, kb1, kw2, kb2 = jax.random.split(key, 5)

    x = jax.random.normal(kx, (N, D_IN), dtype=jnp.float32)

    # PyTorch-style uniform fan-in init.
    bound1 = 1.0 / math.sqrt(D_IN)
    w1 = jax.random.uniform(kw1, (D_IN, H), jnp.float32, -bound1, bound1)
    b1 = jax.random.uniform(kb1, (1, H), jnp.float32, -bound1, bound1)
    gamma = jnp.ones((1, H), jnp.float32)   # BatchNorm1d affine weight
    beta = jnp.zeros((1, H), jnp.float32)   # BatchNorm1d affine bias
    bound2 = 1.0 / math.sqrt(H)
    w2 = jax.random.uniform(kw2, (H, D_OUT), jnp.float32, -bound2, bound2)
    b2 = jax.random.uniform(kb2, (1, D_OUT), jnp.float32, -bound2, bound2)

    out = global_embedding(x, w1, b1, gamma, beta, w2, b2)
    out = jax.block_until_ready(out)

    ref = global_embedding_ref(x, w1, b1, gamma, beta, w2, b2)
    assert out.shape == (N, D_OUT)
    assert jnp.allclose(out, ref, atol=1e-4, rtol=1e-4), "mismatch vs reference"

    print("KERNEL_OK")
</pallas_src>

<mosaic_0001>
module attributes {stable_mosaic.version = 11 : i64} {
  func.func @_global_embedding_kernel(%arg0: memref<8x128xf32, #tpu.memory_space<vmem>>, %arg1: memref<128x128xf32, #tpu.memory_space<vmem>>, %arg2: memref<1x128xf32, #tpu.memory_space<vmem>>, %arg3: memref<1x128xf32, #tpu.memory_space<vmem>>, %arg4: memref<128x128xf32, #tpu.memory_space<vmem>>, %arg5: memref<8x128xf32, #tpu.memory_space<vmem>>) attributes {dimension_semantics = [], scalar_prefetch = 0 : i64, scratch_operands = 0 : i64, tpu.core_type = #tpu.core_type<tc>} {
    %c0 = arith.constant 0 : index
    %c0_0 = arith.constant 0 : index
    %0 = vector.load %arg0[%c0, %c0_0] : memref<8x128xf32, #tpu.memory_space<vmem>>, vector<8x128xf32>
    %c0_1 = arith.constant 0 : index
    %c0_2 = arith.constant 0 : index
    %1 = vector.load %arg1[%c0_1, %c0_2] : memref<128x128xf32, #tpu.memory_space<vmem>>, vector<128x128xf32>
    %cst = arith.constant dense<0.000000e+00> : vector<8x128xf32>
    %2 = tpu.matmul %0, %1, %cst {dimension_numbers = #tpu.dot_dimension_numbers<[1], [0], [0], [1], [0, 0, 1, 1], [], []>} : vector<8x128xf32>, vector<128x128xf32>, vector<8x128xf32> -> vector<8x128xf32>
    %cst_3 = arith.constant dense<0.000000e+00> : vector<128xf32>
    %3 = vector.multi_reduction <add>, %2, %cst_3 [0] : vector<8x128xf32> to vector<128xf32>
    %4 = vector.shape_cast %3 : vector<128xf32> to vector<1x128xf32>
    %cst_4 = arith.constant 8.000000e+00 : f32
    %5 = vector.broadcast %cst_4 : f32 to vector<1x128xf32>
    %6 = arith.divf %4, %5 : vector<1x128xf32>
    %7 = vector.broadcast %6 : vector<1x128xf32> to vector<8x128xf32>
    %8 = arith.subf %2, %7 : vector<8x128xf32>
    %9 = arith.mulf %8, %8 : vector<8x128xf32>
    %cst_5 = arith.constant dense<0.000000e+00> : vector<128xf32>
    %10 = vector.multi_reduction <add>, %9, %cst_5 [0] : vector<8x128xf32> to vector<128xf32>
    %11 = vector.shape_cast %10 : vector<128xf32> to vector<1x128xf32>
    %cst_6 = arith.constant 8.000000e+00 : f32
    %12 = vector.broadcast %cst_6 : f32 to vector<1x128xf32>
    %13 = arith.divf %11, %12 : vector<1x128xf32>
    %c0_7 = arith.constant 0 : index
    %c0_8 = arith.constant 0 : index
    %14 = vector.load %arg2[%c0_7, %c0_8] : memref<1x128xf32, #tpu.memory_space<vmem>>, vector<1x128xf32>
    %cst_9 = arith.constant 9.99999974E-6 : f32
    %15 = vector.broadcast %cst_9 : f32 to vector<1x128xf32>
    %16 = arith.addf %13, %15 : vector<1x128xf32>
    %17 = math.rsqrt %16 : vector<1x128xf32>
    %18 = arith.mulf %14, %17 : vector<1x128xf32>
    %19 = vector.broadcast %18 : vector<1x128xf32> to vector<8x128xf32>
    %20 = arith.mulf %8, %19 : vector<8x128xf32>
    %c0_10 = arith.constant 0 : index
    %c0_11 = arith.constant 0 : index
    %21 = vector.load %arg3[%c0_10, %c0_11] : memref<1x128xf32, #tpu.memory_space<vmem>>, vector<1x128xf32>
    %22 = vector.broadcast %21 : vector<1x128xf32> to vector<8x128xf32>
    %23 = arith.addf %20, %22 : vector<8x128xf32>
    %cst_12 = arith.constant 0.000000e+00 : f32
    %24 = vector.broadcast %cst_12 : f32 to vector<8x128xf32>
    %25 = arith.maximumf %23, %24 : vector<8x128xf32>
    %c0_13 = arith.constant 0 : index
    %c0_14 = arith.constant 0 : index
    %26 = vector.load %arg4[%c0_13, %c0_14] : memref<128x128xf32, #tpu.memory_space<vmem>>, vector<128x128xf32>
    %cst_15 = arith.constant dense<0.000000e+00> : vector<8x128xf32>
    %27 = tpu.matmul %25, %26, %cst_15 {dimension_numbers = #tpu.dot_dimension_numbers<[1], [0], [0], [1], [0, 0, 1, 1], [], []>} : vector<8x128xf32>, vector<128x128xf32>, vector<8x128xf32> -> vector<8x128xf32>
    %cst_16 = arith.constant dense<0.000000e+00> : vector<128xf32>
    %28 = vector.multi_reduction <add>, %27, %cst_16 [0] : vector<8x128xf32> to vector<128xf32>
    %29 = vector.shape_cast %28 : vector<128xf32> to vector<1x128xf32>
    %cst_17 = arith.constant 8.000000e+00 : f32
    %30 = vector.broadcast %cst_17 : f32 to vector<1x128xf32>
    %31 = arith.divf %29, %30 : vector<1x128xf32>
    %32 = vector.broadcast %31 : vector<1x128xf32> to vector<8x128xf32>
    %33 = arith.subf %27, %32 : vector<8x128xf32>
    %34 = arith.mulf %33, %33 : vector<8x128xf32>
    %cst_18 = arith.constant dense<0.000000e+00> : vector<128xf32>
    %35 = vector.multi_reduction <add>, %34, %cst_18 [0] : vector<8x128xf32> to vector<128xf32>
    %36 = vector.shape_cast %35 : vector<128xf32> to vector<1x128xf32>
    %cst_19 = arith.constant 8.000000e+00 : f32
    %37 = vector.broadcast %cst_19 : f32 to vector<1x128xf32>
    %38 = arith.divf %36, %37 : vector<1x128xf32>
    %cst_20 = arith.constant 9.99999974E-6 : f32
    %39 = vector.broadcast %cst_20 : f32 to vector<1x128xf32>
    %40 = arith.addf %38, %39 : vector<1x128xf32>
    %41 = math.rsqrt %40 : vector<1x128xf32>
    %42 = vector.broadcast %41 : vector<1x128xf32> to vector<8x128xf32>
    %43 = arith.mulf %33, %42 : vector<8x128xf32>
    %c0_21 = arith.constant 0 : index
    %c0_22 = arith.constant 0 : index
    %44 = vector.load %arg5[%c0_21, %c0_22] : memref<8x128xf32, #tpu.memory_space<vmem>>, vector<8x128xf32>
    tpu.vector_store %arg5[%c0_21, %c0_22], %43 {strides = array<i32>} : memref<8x128xf32, #tpu.memory_space<vmem>>, vector<8x128xf32>,
    return
  }
}

</mosaic_0001>

<bundles_post_ra>
// kernel: tpu_custom_call.1
= control target key start
LH: loop header
LB: loop body
LE: loop exit
PB: predicated region body
PF: predicated region fallthrough
CT: control target
= control target key end

     0   :  { %10 = vsyncpa [#allocation3], 0  ;;  %s599_s0 = inlined_call_operand.hbm [shape: f32[8,128], index: 0, kind: input, shape index: {}]   ;;  %s600_s1 = inlined_call_operand.hbm [shape: f32[128,128], index: 1, kind: input, shape index: {}]   ;;  %s601_s2 = inlined_call_operand.vmem [shape: f32[1,128], index: 2, kind: input, shape index: {}]   ;;  %s602_s3 = inlined_call_operand.vmem [shape: f32[1,128], index: 3, kind: input, shape index: {}]   ;;  %s603_s4 = inlined_call_operand.hbm [shape: f32[128,128], index: 4, kind: input, shape index: {}]   ;;  %s604_s5 = inlined_call_operand.hbm [shape: f32[8,128], index: 5, kind: output, shape index: {}]  }
   0x1   :  { %11 = vsyncpa [#allocation6], 0 }
   0x2   :  { %12 = vsyncpa [#allocation4], 0  ;;  %s509_s18 = smov [#allocation5]  }
   0x3   :  { %s28_s19 = sshll.u32 %s509_s18, 4  ;;  %s29_s19 = int_to_ptr.vmem [resolvable:$true] %s28_s19 }
   0x4   :  { %s431_s20 = scalar_lea.vmem %s29_s19, 2048  ;;  %p436_p1 = scmp.lt.s32.totalorder %s29_s19, %s29_s19 }
   0x5   :  { %p432_p0 = scmp.ne.s32.totalorder %s29_s19, %s431_s20  ;;  %p437_p2 = scmp.lt.s32.totalorder %s431_s20, %s431_s20 }
   0x7   :  { %p438_p3 = por %p437_p2, %p436_p1 }
   0x9   :  { %p439_p4 = pnand %p438_p3, %p432_p0 }
   0xb   :  { %442 = shalt.err (!%p439_p4)
}
   0xc   :  { %s510_s21 = smov 128   ;;  %s511_s22 = smov 8  }
   0xd   :  { %34 = dma.hbm_to_vmem [thread:$0]  %s600_s1, 2048, %s29_s19, [#allocation6], %s510_s21, %s510_s21, %s511_s22  }
   0xe   :  { %s512_s25 = smov [#allocation2]   ;;  %s513_s27 = smov [#allocation7]  }
   0xf   :  { %s19_s26 = sshll.u32 %s512_s25, 4  ;;  %s44_s28 = sshll.u32 %s513_s27, 4  ;;  %s20_s26 = int_to_ptr.vmem [resolvable:$true] %s19_s26  ;;  %s45_s28 = int_to_ptr.vmem [resolvable:$true] %s44_s28 }
  0x10   :  { %s451_s29 = scalar_lea.vmem %s20_s26, 128  ;;  %p456_p6 = scmp.lt.s32.totalorder %s20_s26, %s20_s26 }
  0x11   :  { %p452_p5 = scmp.ne.s32.totalorder %s20_s26, %s451_s29  ;;  %p457_p7 = scmp.lt.s32.totalorder %s451_s29, %s451_s29 }
  0x13   :  { %p458_p8 = por %p457_p7, %p456_p6 }
  0x15   :  { %p459_p9 = pnand %p458_p8, %p452_p5 }
  0x17   :  { %462 = shalt.err (!%p459_p9)
}
  0x18   :  { %22 = dma.hbm_to_vmem [thread:$0]  %s599_s0, 128, %s20_s26, [#allocation3]  }
  0x19   :  { %s471_s7 = scalar_lea.vmem %s45_s28, 2048  ;;  %p476_p11 = scmp.lt.s32.totalorder %s45_s28, %s45_s28 }
  0x1a   :  { %p472_p10 = scmp.ne.s32.totalorder %s45_s28, %s471_s7  ;;  %p477_p12 = scmp.lt.s32.totalorder %s471_s7, %s471_s7 }
  0x1c   :  { %p478_p13 = por %p477_p12, %p476_p11 }
  0x1e   :  { %p479_p0 = pnand %p478_p13, %p472_p10 }
  0x20   :  { %482 = shalt.err (!%p479_p0)
}
  0x21   :  { %50 = dma.hbm_to_vmem [thread:$0]  %s603_s4, 2048, %s45_s28, [#allocation6], %s510_s21, %s510_s21, %s511_s22  }
  0x22   :  { %503 = dma.done.wait [#allocation3], 128  }
  0x23   :  { %504 = vsyncadd [#allocation3], 4294967168 }
  0x24   :  { %505 = dma.done.wait [#allocation6], 4096  }
  0x25   :  { %506 = vsyncadd [#allocation6], 4294963200  ;;  %v514_v0 = vmov 0.0   ;;  %vm515_vm0 = vmmov 0   ;;  %v76_v1 = vld [vmem:[#allocation5 + $0x78] sm:$0xff]  ;;  %v75_v2 = vld [vmem:[#allocation5 + $0x70] sm:$0xff]  ;;  %v169_v53 = vlaneseq }
  0x26   :  { %341 = vmatprep.subr.mxu0 %v514_v0  ;;  %373 = vmatprep.mubr.msk.f32.mxu0 %vm515_vm0, %v514_v0  ;;  %v74_v3 = vld [vmem:[#allocation5 + $0x68] sm:$0xff]  ;;  %v73_v4 = vld [vmem:[#allocation5 + $0x60] sm:$0xff]  ;;  %v72_v5 = vld [vmem:[#allocation5 + $0x58] sm:$0xff] }
  0x27   :  { %376 = vmatprep.subr.mxu1 %v514_v0  ;;  %408 = vmatprep.mubr.msk.f32.mxu1 %vm515_vm0, %v514_v0  ;;  %v71_v6 = vld [vmem:[#allocation5 + $0x50] sm:$0xff]  ;;  %v70_v7 = vld [vmem:[#allocation5 + $0x48] sm:$0xff]  ;;  %v69_v8 = vld [vmem:[#allocation5 + $0x40] sm:$0xff]  ;;  %v170_v54 = vshrl.u32 %v169_v53, 7 }
  0x28   :  { %342 = vmatpush3.msra.mxu0 %v76_v1  ;;  %v68_v9 = vld [vmem:[#allocation5 + $0x38] sm:$0xff]  ;;  %v67_v10 = vld [vmem:[#allocation5 + $0x30] sm:$0xff]  ;;  %v66_v11 = vld [vmem:[#allocation5 + $0x28] sm:$0xff] }
  0x29   :  { %343 = vmatprep.subr.mxu0 %v514_v0  ;;  %v65_v12 = vld [vmem:[#allocation5 + $0x20] sm:$0xff]  ;;  %v64_v13 = vld [vmem:[#allocation5 + $0x18] sm:$0xff]  ;;  %v63_v14 = vld [vmem:[#allocation5 + $0x10] sm:$0xff]  ;;  %v171_v56 = vsub.s32 0, %v170_v54 }
  0x2a   :  { %344 = vmatpush3.msra.mxu0 %v75_v2  ;;  %v62_v15 = vld [vmem:[#allocation5 + $0x8] sm:$0xff]  ;;  %v61_v16 = vld [vmem:[#allocation5] sm:$0xff]  ;;  %v60_v17 = vld [vmem:[#allocation2] sm:$0xff] }
  0x2b   :  { %345 = vmatprep.subr.mxu0 %v514_v0  ;;  %v199_v18 = vld [vmem:[#allocation7 + $0x78] sm:$0xff]  ;;  %v198_v19 = vld [vmem:[#allocation7 + $0x70] sm:$0xff]  ;;  %v197_v20 = vld [vmem:[#allocation7 + $0x68] sm:$0xff] }
  0x2c   :  { %346 = vmatpush3.msra.mxu0 %v74_v3  ;;  %377 = vmatpush3.msra.mxu1 %v199_v18  ;;  %v196_v21 = vld [vmem:[#allocation7 + $0x60] sm:$0xff]  ;;  %v195_v22 = vld [vmem:[#allocation7 + $0x58] sm:$0xff]  ;;  %v194_v23 = vld [vmem:[#allocation7 + $0x50] sm:$0xff] }
  0x2d   :  { %347 = vmatprep.subr.mxu0 %v514_v0  ;;  %378 = vmatprep.subr.mxu1 %v514_v0  ;;  %v193_v24 = vld [vmem:[#allocation7 + $0x48] sm:$0xff]  ;;  %v192_v25 = vld [vmem:[#allocation7 + $0x40] sm:$0xff]  ;;  %v191_v26 = vld [vmem:[#allocation7 + $0x38] sm:$0xff] }
  0x2e   :  { %348 = vmatpush3.msra.mxu0 %v73_v4  ;;  %379 = vmatpush3.msra.mxu1 %v198_v19  ;;  %v190_v27 = vld [vmem:[#allocation7 + $0x30] sm:$0xff]  ;;  %v189_v28 = vld [vmem:[#allocation7 + $0x28] sm:$0xff]  ;;  %v188_v29 = vld [vmem:[#allocation7 + $0x20] sm:$0xff] }
  0x2f   :  { %349 = vmatprep.subr.mxu0 %v514_v0  ;;  %380 = vmatprep.subr.mxu1 %v514_v0  ;;  %v187_v30 = vld [vmem:[#allocation7 + $0x18] sm:$0xff]  ;;  %v186_v31 = vld [vmem:[#allocation7 + $0x10] sm:$0xff]  ;;  %v185_v32 = vld [vmem:[#allocation7 + $0x8] sm:$0xff] }
  0x30   :  { %350 = vmatpush3.msra.mxu0 %v72_v5  ;;  %381 = vmatpush3.msra.mxu1 %v197_v20  ;;  %v184_v33 = vld [vmem:[#allocation7] sm:$0xff]  ;;  %v164_v55 = vld [vmem:[%s601_s2] sm:$0x1]  ;;  %s516_s2 = smov [#allocation8]  }
  0x31   :  { %351 = vmatprep.subr.mxu0 %v514_v0  ;;  %382 = vmatprep.subr.mxu1 %v514_v0  ;;  %v306_v60 = vld [vmem:[%s602_s3] ss:$0 sm:$0xff]  ;;  %s296_s3 = sshll.u32 %s516_s2, 4  ;;  %s297_s3 = int_to_ptr.vmem [resolvable:$true] %s296_s3 }
  0x32   :  { %352 = vmatpush3.msra.mxu0 %v71_v6  ;;  %383 = vmatpush3.msra.mxu1 %v196_v21  ;;  %s483_s11 = scalar_lea.vmem %s297_s3, 128  ;;  %p488_p2 = scmp.lt.s32.totalorder %s297_s3, %s297_s3 }
  0x33   :  { %353 = vmatprep.subr.mxu0 %v514_v0  ;;  %384 = vmatprep.subr.mxu1 %v514_v0  ;;  %p484_p1 = scmp.ne.s32.totalorder %s297_s3, %s483_s11  ;;  %p489_p3 = scmp.lt.s32.totalorder %s483_s11, %s483_s11 }
  0x34   :  { %354 = vmatpush3.msra.mxu0 %v70_v7  ;;  %385 = vmatpush3.msra.mxu1 %v195_v22 }
  0x35   :  { %355 = vmatprep.subr.mxu0 %v514_v0  ;;  %386 = vmatprep.subr.mxu1 %v514_v0  ;;  %p490_p4 = por %p489_p3, %p488_p2 }
  0x36   :  { %356 = vmatpush3.msra.mxu0 %v69_v8  ;;  %387 = vmatpush3.msra.mxu1 %v194_v23 }
  0x37   :  { %357 = vmatprep.subr.mxu0 %v514_v0  ;;  %388 = vmatprep.subr.mxu1 %v514_v0  ;;  %p491_p5 = pnand %p490_p4, %p484_p1 }
  0x38   :  { %358 = vmatpush3.msra.mxu0 %v68_v9  ;;  %389 = vmatpush3.msra.mxu1 %v193_v24 }
  0x39   :  { %359 = vmatprep.subr.mxu0 %v514_v0  ;;  %390 = vmatprep.subr.mxu1 %v514_v0 }
  0x3a   :  { %360 = vmatpush3.msra.mxu0 %v67_v10  ;;  %391 = vmatpush3.msra.mxu1 %v192_v25 }
  0x3b   :  { %361 = vmatprep.subr.mxu0 %v514_v0  ;;  %392 = vmatprep.subr.mxu1 %v514_v0 }
  0x3c   :  { %362 = vmatpush3.msra.mxu0 %v66_v11  ;;  %393 = vmatpush3.msra.mxu1 %v191_v26 }
  0x3d   :  { %363 = vmatprep.subr.mxu0 %v514_v0  ;;  %394 = vmatprep.subr.mxu1 %v514_v0 }
  0x3e   :  { %364 = vmatpush3.msra.mxu0 %v65_v12  ;;  %395 = vmatpush3.msra.mxu1 %v190_v27 }
  0x3f   :  { %365 = vmatprep.subr.mxu0 %v514_v0  ;;  %396 = vmatprep.subr.mxu1 %v514_v0 }
  0x40   :  { %366 = vmatpush3.msra.mxu0 %v64_v13  ;;  %397 = vmatpush3.msra.mxu1 %v189_v28 }
  0x41   :  { %367 = vmatprep.subr.mxu0 %v514_v0  ;;  %398 = vmatprep.subr.mxu1 %v514_v0 }
  0x42   :  { %368 = vmatpush3.msra.mxu0 %v63_v14  ;;  %399 = vmatpush3.msra.mxu1 %v188_v29 }
  0x43   :  { %369 = vmatprep.subr.mxu0 %v514_v0  ;;  %400 = vmatprep.subr.mxu1 %v514_v0 }
  0x44   :  { %370 = vmatpush3.msra.mxu0 %v62_v15  ;;  %401 = vmatpush3.msra.mxu1 %v187_v30 }
  0x45   :  { %371 = vmatprep.subr.mxu0 %v514_v0  ;;  %402 = vmatprep.subr.mxu1 %v514_v0 }
  0x46   :  { %372 = vmatpush3.msra.mxu0 %v61_v16  ;;  %403 = vmatpush3.msra.mxu1 %v186_v31 }
  0x47   :  { %374 = vmatmul.mubr.f32.vlgmr.msra.gmra.mxu0 %v60_v17  ;;  %404 = vmatprep.subr.mxu1 %v514_v0 }
  0x48   :  { %405 = vmatpush3.msra.mxu1 %v185_v32 }
  0x49   :  { %406 = vmatprep.subr.mxu1 %v514_v0 }
  0x4a   :  { %407 = vmatpush3.msra.mxu1 %v184_v33 }
 0x107   :  { %v143_v34 = vpop.f32.mrf.mxu0 }
 0x108   :  { %v147_v35 = vrot.slane %v143_v34, 4 }
 0x109   :  { %v375_v36 = vpop.f32.mrf.mxu0 }
 0x10a   :  { %v148_v37 = vadd.f32 %v147_v35, %v143_v34 }
 0x10c   :  { %v149_v38 = vrot.slane %v148_v37, 2 }
 0x10e   :  { %v150_v39 = vadd.f32 %v149_v38, %v148_v37 }
 0x110   :  { %v151_v40 = vrot.slane %v150_v39, 1 }
 0x112   :  { %v152_v41 = vadd.f32 %v151_v40, %v150_v39 }
 0x114   :  { %v154_v42 = vmul.f32 0.125, %v152_v41 }
 0x116   :  { %v155_v43 = vsub.f32 %v143_v34, %v154_v42 }
 0x118   :  { %v156_v44 = vmul.f32 %v155_v43, %v155_v43 }
 0x11a   :  { %v157_v45 = vrot.slane %v156_v44, 4 }
 0x11c   :  { %v158_v46 = vadd.f32 %v157_v45, %v156_v44 }
 0x11e   :  { %v159_v47 = vrot.slane %v158_v46, 2 }
 0x120   :  { %v160_v48 = vadd.f32 %v159_v47, %v158_v46 }
 0x122   :  { %v161_v49 = vrot.slane %v160_v48, 1 }
 0x124   :  { %v162_v50 = vadd.f32 %v161_v49, %v160_v48 }
 0x126   :  { %v163_v51 = vmul.f32 0.125, %v162_v50 }
 0x128   :  { %v165_v52 = vadd.f32 1e-05, %v163_v51 }
 0x12a   :  { %419 = vrsqrt.f32 %v165_v52 }
 0x137   :  { %v420_v57 = vpop.eup %419 }
 0x138   :  { %v167_v58 = vmul.f32 %v420_v57, %v164_v55 }
 0x13a   :  { %v172_v59 = vrot.slane %v167_v58, %v171_v56 }
 0x13c   :  { %v174_v61 = vmul.f32 %v172_v59, %v155_v43 }
 0x13e   :  { %v182_v62 = vadd.f32 %v306_v60, %v174_v61 }
 0x140   :  { %v183_v63 = vmax.f32 %v182_v62, 0.0 }
 0x142   :  { %409 = vmatmul.mubr.f32.vlgmr.msra.gmra.mxu1 %v183_v63 }
 0x202   :  { %v266_v0 = vpop.f32.mrf.mxu1 }
 0x203   :  { %v270_v1 = vrot.slane %v266_v0, 4 }
 0x204   :  { %v410_v2 = vpop.f32.mrf.mxu1 }
 0x205   :  { %v271_v3 = vadd.f32 %v270_v1, %v266_v0 }
 0x207   :  { %v272_v4 = vrot.slane %v271_v3, 2 }
 0x209   :  { %v273_v5 = vadd.f32 %v272_v4, %v271_v3 }
 0x20b   :  { %v274_v6 = vrot.slane %v273_v5, 1 }
 0x20d   :  { %v275_v7 = vadd.f32 %v274_v6, %v273_v5 }
 0x20f   :  { %v276_v8 = vmul.f32 0.125, %v275_v7 }
 0x211   :  { %v277_v9 = vsub.f32 %v266_v0, %v276_v8 }
 0x213   :  { %v278_v10 = vmul.f32 %v277_v9, %v277_v9 }
 0x215   :  { %v279_v11 = vrot.slane %v278_v10, 4 }
 0x217   :  { %v280_v12 = vadd.f32 %v279_v11, %v278_v10 }
 0x219   :  { %v281_v13 = vrot.slane %v280_v12, 2 }
 0x21b   :  { %v282_v14 = vadd.f32 %v281_v13, %v280_v12 }
 0x21d   :  { %v283_v15 = vrot.slane %v282_v14, 1 }
 0x21f   :  { %v284_v16 = vadd.f32 %v283_v15, %v282_v14 }
 0x221   :  { %v285_v17 = vmul.f32 0.125, %v284_v16 }
 0x223   :  { %v286_v18 = vadd.f32 1e-05, %v285_v17 }
 0x225   :  { %421 = vrsqrt.f32 %v286_v18 }
 0x232   :  { %v422_v19 = vpop.eup %421 }
 0x233   :  { %v288_v20 = vmul.f32 %v422_v19, %v277_v9 }
 0x235   :  { %289 = vst [vmem:[#allocation8] sm:$0xff] %v288_v20 }
 0x236   :  { %494 = shalt.err (!%p491_p5)
}
 0x237   :  { %299 = dma.vmem_to_hbm [thread:$0]  %s297_s3, 128, %s604_s5, [#allocation4]  }
 0x238   :  { %507 = dma.done.wait [#allocation4], 128  }
 0x239   :  { %508 = vsyncadd [#allocation4], 4294967168 }
 0x23a   :  { %303 = vsyncpa [#allocation3], 1 }
 0x23b   :  { %304 = vsyncpa [#allocation6], 1 }
 0x23c   :  { %305 = vsyncpa [#allocation4], 1 }

</bundles_post_ra>
